<compile_context>
chip_gen: v7x
topology: tpu7x:2x2x1
jax: 0.10.0
libtpu: 0.0.40
codegen_flags: <defaults>
</compile_context>

<pallas_src>
import jax
import jax.numpy as jnp
from jax import lax
from jax.experimental import pallas as pl
from jax.experimental.pallas import tpu as pltpu


def ffn_kernel(x_ref, w1_ref, b1_ref, w2_ref, b2_ref, o_ref, acc_ref):
    # x_ref:  (tm, d_model)      row tile, resident across the k axis
    # w1_ref: (tf, d_model)      slab of W1 (native nn.Linear layout)
    # b1_ref: (1, tf)            slab of b1
    # w2_ref: (d_model, tf)      slab of W2 (native nn.Linear layout)
    # b2_ref: (1, d_model)
    # o_ref:  (tm, d_model)      written only on the last reduction step
    # acc_ref:(tm, d_model) f32  VMEM accumulator
    k = pl.program_id(1)

    @pl.when(k == 0)
    def _():
        acc_ref[...] = jnp.zeros_like(acc_ref)

    x = x_ref[...]
    # h = relu(x @ W1_slab^T + b1_slab): contract d_model (last dim of both).
    h = lax.dot_general(
        x, w1_ref[...],
        dimension_numbers=(((1,), (1,)), ((), ())),
        preferred_element_type=jnp.float32,
    )
    h = jnp.maximum(h + b1_ref[...], 0.0)
    # dropout: identity in eval mode.
    # acc += h @ W2_slab^T: contract tf (last dim of both); feed MXU in the
    # weight dtype (bf16 in production), accumulate in f32.
    acc_ref[...] += lax.dot_general(
        h.astype(w2_ref.dtype), w2_ref[...],
        dimension_numbers=(((1,), (1,)), ((), ())),
        preferred_element_type=jnp.float32,
    )

    @pl.when(k == pl.num_programs(1) - 1)
    def _():
        o_ref[...] = (acc_ref[...] + b2_ref[...]).astype(o_ref.dtype)


def _choose_tiles(rows, d_model, d_ff):
    # Row tile: as large as practical (amortizes weight streaming and the
    # ~0.35us per-grid-step overhead).  256 is safe on v5e/v6e/v7x VMEM budgets.
    tm = min(256, ((rows + 7) // 8) * 8)
    # d_ff slab: full d_ff when small; otherwise a divisor of d_ff that is a
    # multiple of 128 (lane constraint on the (d_model, tf) / (1, tf) blocks).
    tf = d_ff
    if d_ff > 1024:
        for cand in (512, 256, 128):
            if d_ff % cand == 0:
                tf = cand
                break
    return tm, tf


def positionwise_feed_forward(x, w1, b1, w2, b2, *, compute_dtype=None,
                              tm=None, tf=None):
    """x: (B, S, d_model).  PyTorch nn.Linear layouts:
       w1: (d_ff, d_model), b1: (d_ff,), w2: (d_model, d_ff), b2: (d_model,).
       compute_dtype=jnp.bfloat16 is the recommended production setting
       (in a real model the weights would already be stored in bf16)."""
    out_dtype = x.dtype
    B, S, d_model = x.shape
    d_ff = w1.shape[0]
    assert w1.shape == (d_ff, d_model) and w2.shape == (d_model, d_ff)

    if compute_dtype is not None:
        x = x.astype(compute_dtype)
        w1 = w1.astype(compute_dtype)
        b1 = b1.astype(compute_dtype)
        w2 = w2.astype(compute_dtype)
        b2 = b2.astype(compute_dtype)

    rows = B * S
    tm_d, tf_d = _choose_tiles(rows, d_model, d_ff)
    tm = tm_d if tm is None else tm
    tf = tf_d if tf is None else tf
    assert d_ff % tf == 0 and tm % 8 == 0

    rows_p = ((rows + tm - 1) // tm) * tm
    x2d = x.reshape(rows, d_model)
    if rows_p != rows:
        x2d = jnp.pad(x2d, ((0, rows_p - rows), (0, 0)))

    b1_2d = b1.reshape(1, d_ff)
    b2_2d = b2.reshape(1, d_model)

    itemsize = jnp.dtype(x2d.dtype).itemsize
    # Advisory cost estimate for XLA's scheduler.
    flops = 4 * rows_p * d_model * d_ff
    bytes_accessed = itemsize * (2 * rows_p * d_model
                                 + 2 * d_model * d_ff + d_ff + d_model)
    # VMEM budget: double-buffered in/out tiles + f32 accumulator, with
    # headroom, clamped to v7x's 64 MiB physical capacity.
    vmem_est = 2 * itemsize * (2 * tm * d_model + 2 * tf * d_model
                               + tf + d_model) + 4 * tm * d_model
    vmem_limit = int(min(max(2 * vmem_est, 32 * 1024 * 1024), 64 * 1024 * 1024))

    out2d = pl.pallas_call(
        ffn_kernel,
        out_shape=jax.ShapeDtypeStruct((rows_p, d_model), out_dtype),
        grid_spec=pltpu.PrefetchScalarGridSpec(
            num_scalar_prefetch=0,
            grid=(rows_p // tm, d_ff // tf),          # (rows, d_ff-reduction)
            in_specs=[
                pl.BlockSpec((tm, d_model), lambda i, k: (i, 0)),   # x rows
                pl.BlockSpec((tf, d_model), lambda i, k: (k, 0)),   # W1 slab
                pl.BlockSpec((1, tf),       lambda i, k: (0, k)),   # b1 slab
                pl.BlockSpec((d_model, tf), lambda i, k: (0, k)),   # W2 slab
                pl.BlockSpec((1, d_model),  lambda i, k: (0, 0)),   # b2
            ],
            out_specs=pl.BlockSpec((tm, d_model), lambda i, k: (i, 0)),
            scratch_shapes=[pltpu.VMEM((tm, d_model), jnp.float32)],
        ),
        compiler_params=pltpu.CompilerParams(
            dimension_semantics=("parallel", "arbitrary"),
            vmem_limit_bytes=vmem_limit,
        ),
        cost_estimate=pl.CostEstimate(
            flops=flops, transcendentals=0, bytes_accessed=bytes_accessed),
    )(x2d, w1, b1_2d, w2, b2_2d)

    if rows_p != rows:
        out2d = out2d[:rows]
    return out2d.reshape(B, S, d_model)


def ffn_reference(x, w1, b1, w2, b2):
    h = jnp.maximum(jnp.einsum("bsd,fd->bsf", x, w1) + b1, 0.0)
    return jnp.einsum("bsf,df->bsd", h, w2) + b2


if __name__ == "__main__":
    # Small shapes consistent with the module: batch=2, seq=8, d_model=32, d_ff=64.
    # (Note: production d_model should be a multiple of 128 for lane-dense stores.)
    B, S, d_model, d_ff = 2, 8, 32, 64

    key = jax.random.PRNGKey(0)
    kx, k1, kb1, k2, kb2 = jax.random.split(key, 5)

    x = jax.random.normal(kx, (B, S, d_model), dtype=jnp.float32)
    w1 = jax.random.normal(k1, (d_ff, d_model), dtype=jnp.float32) * 0.1
    b1 = jax.random.normal(kb1, (d_ff,), dtype=jnp.float32) * 0.1
    w2 = jax.random.normal(k2, (d_model, d_ff), dtype=jnp.float32) * 0.1
    b2 = jax.random.normal(kb2, (d_model,), dtype=jnp.float32) * 0.1

    ref = ffn_reference(x, w1, b1, w2, b2)

    # f32 path — exact validation against the reference.
    out = jax.block_until_ready(positionwise_feed_forward(x, w1, b1, w2, b2))
    assert out.shape == (B, S, d_model)
    assert jnp.allclose(out, ref, atol=1e-5, rtol=1e-5)

    # bf16 MXU path (production config: bf16 operands, f32 accumulation).
    out_bf16 = jax.block_until_ready(
        positionwise_feed_forward(x, w1, b1, w2, b2, compute_dtype=jnp.bfloat16))
    assert out_bf16.shape == (B, S, d_model)
    assert jnp.allclose(out_bf16, ref, atol=5e-2, rtol=5e-2)

    print("KERNEL_OK")
</pallas_src>

<mosaic_0001>
module attributes {stable_mosaic.version = 11 : i64} {
  func.func @ffn_kernel(%arg0: i32, %arg1: i32, %arg2: memref<16x32xf32, #tpu.memory_space<vmem>>, %arg3: memref<64x32xf32, #tpu.memory_space<vmem>>, %arg4: memref<1x64xf32, #tpu.memory_space<vmem>>, %arg5: memref<32x64xf32, #tpu.memory_space<vmem>>, %arg6: memref<1x32xf32, #tpu.memory_space<vmem>>, %arg7: memref<16x32xf32, #tpu.memory_space<vmem>>, %arg8: memref<16x32xf32, #tpu.memory_space<vmem>>) attributes {dimension_semantics = [#tpu.dimension_semantics<parallel>, #tpu.dimension_semantics<arbitrary>], iteration_bounds = array<i64: 1, 1>, scalar_prefetch = 0 : i64, scratch_operands = 1 : i64, tpu.core_type = #tpu.core_type<tc>, window_params = [{transform_indices = @transform_0, window_bounds = array<i64: 16, 32>}, {transform_indices = @transform_1, window_bounds = array<i64: 64, 32>}, {transform_indices = @transform_2, window_bounds = array<i64: 1, 64>}, {transform_indices = @transform_3, window_bounds = array<i64: 32, 64>}, {pipeline_mode = #tpu.pipeline_mode<synchronous>, transform_indices = @transform_4, window_bounds = array<i64: 1, 32>}, {transform_indices = @transform_5, window_bounds = array<i64: 16, 32>}]} {
    %c0_i32 = arith.constant 0 : i32
    %0 = arith.cmpi eq, %arg1, %c0_i32 : i32
    %1 = arith.extui %0 : i1 to i32
    %c0_i32_0 = arith.constant 0 : i32
    %2 = arith.cmpi ne, %1, %c0_i32_0 : i32
    scf.if %2 {
      %cst_16 = arith.constant 0.000000e+00 : f32
      %19 = vector.broadcast %cst_16 : f32 to vector<16x32xf32>
      %c0_17 = arith.constant 0 : index
      %c0_18 = arith.constant 0 : index
      %20 = vector.load %arg8[%c0_17, %c0_18] : memref<16x32xf32, #tpu.memory_space<vmem>>, vector<16x32xf32>
      tpu.vector_store %arg8[%c0_17, %c0_18], %19 {strides = array<i32>} : memref<16x32xf32, #tpu.memory_space<vmem>>, vector<16x32xf32>,
    } else {
    }
    %c0 = arith.constant 0 : index
    %c0_1 = arith.constant 0 : index
    %3 = vector.load %arg2[%c0, %c0_1] : memref<16x32xf32, #tpu.memory_space<vmem>>, vector<16x32xf32>
    %c0_2 = arith.constant 0 : index
    %c0_3 = arith.constant 0 : index
    %4 = vector.load %arg3[%c0_2, %c0_3] : memref<64x32xf32, #tpu.memory_space<vmem>>, vector<64x32xf32>
    %cst = arith.constant dense<0.000000e+00> : vector<16x64xf32>
    %5 = tpu.matmul %3, %4, %cst {dimension_numbers = #tpu.dot_dimension_numbers<[1], [1], [0], [0], [0, 0, 1, 0], [], []>} : vector<16x32xf32>, vector<64x32xf32>, vector<16x64xf32> -> vector<16x64xf32>
    %c0_4 = arith.constant 0 : index
    %c0_5 = arith.constant 0 : index
    %6 = vector.load %arg4[%c0_4, %c0_5] : memref<1x64xf32, #tpu.memory_space<vmem>>, vector<1x64xf32>
    %7 = vector.broadcast %6 : vector<1x64xf32> to vector<16x64xf32>
    %8 = arith.addf %5, %7 : vector<16x64xf32>
    %cst_6 = arith.constant 0.000000e+00 : f32
    %9 = vector.broadcast %cst_6 : f32 to vector<16x64xf32>
    %10 = arith.maximumf %8, %9 : vector<16x64xf32>
    %c0_7 = arith.constant 0 : index
    %c0_8 = arith.constant 0 : index
    %11 = vector.load %arg8[%c0_7, %c0_8] : memref<16x32xf32, #tpu.memory_space<vmem>>, vector<16x32xf32>
    %c0_9 = arith.constant 0 : index
    %c0_10 = arith.constant 0 : index
    %12 = vector.load %arg5[%c0_9, %c0_10] : memref<32x64xf32, #tpu.memory_space<vmem>>, vector<32x64xf32>
    %cst_11 = arith.constant dense<0.000000e+00> : vector<16x32xf32>
    %13 = tpu.matmul %10, %12, %cst_11 {dimension_numbers = #tpu.dot_dimension_numbers<[1], [1], [0], [0], [0, 0, 1, 0], [], []>} : vector<16x64xf32>, vector<32x64xf32>, vector<16x32xf32> -> vector<16x32xf32>
    %14 = arith.addf %11, %13 : vector<16x32xf32>
    %c0_12 = arith.constant 0 : index
    %c0_13 = arith.constant 0 : index
    %15 = vector.load %arg8[%c0_12, %c0_13] : memref<16x32xf32, #tpu.memory_space<vmem>>, vector<16x32xf32>
    tpu.vector_store %arg8[%c0_12, %c0_13], %14 {strides = array<i32>} : memref<16x32xf32, #tpu.memory_space<vmem>>, vector<16x32xf32>,
    %c0_i32_14 = arith.constant 0 : i32
    %16 = arith.cmpi eq, %arg1, %c0_i32_14 : i32
    %17 = arith.extui %16 : i1 to i32
    %c0_i32_15 = arith.constant 0 : i32
    %18 = arith.cmpi ne, %17, %c0_i32_15 : i32
    scf.if %18 {
      %c0_16 = arith.constant 0 : index
      %c0_17 = arith.constant 0 : index
      %19 = vector.load %arg8[%c0_16, %c0_17] : memref<16x32xf32, #tpu.memory_space<vmem>>, vector<16x32xf32>
      %c0_18 = arith.constant 0 : index
      %c0_19 = arith.constant 0 : index
      %20 = vector.load %arg6[%c0_18, %c0_19] : memref<1x32xf32, #tpu.memory_space<vmem>>, vector<1x32xf32>
      %21 = vector.broadcast %20 : vector<1x32xf32> to vector<16x32xf32>
      %22 = arith.addf %19, %21 : vector<16x32xf32>
      %c0_20 = arith.constant 0 : index
      %c0_21 = arith.constant 0 : index
      %23 = vector.load %arg7[%c0_20, %c0_21] : memref<16x32xf32, #tpu.memory_space<vmem>>, vector<16x32xf32>
      tpu.vector_store %arg7[%c0_20, %c0_21], %22 {strides = array<i32>} : memref<16x32xf32, #tpu.memory_space<vmem>>, vector<16x32xf32>,
    } else {
    }
    return
  }
  func.func @transform_0(%arg0: i32, %arg1: i32) -> (i32, i32) {
    %c0_i32 = arith.constant 0 : i32
    %c0_i32_0 = arith.constant 0 : i32
    return %arg0, %c0_i32 : i32, i32
  }
  func.func @transform_1(%arg0: i32, %arg1: i32) -> (i32, i32) {
    %c0_i32 = arith.constant 0 : i32
    %c0_i32_0 = arith.constant 0 : i32
    return %arg1, %c0_i32 : i32, i32
  }
  func.func @transform_2(%arg0: i32, %arg1: i32) -> (i32, i32) {
    %c0_i32 = arith.constant 0 : i32
    %c0_i32_0 = arith.constant 0 : i32
    return %c0_i32, %arg1 : i32, i32
  }
  func.func @transform_3(%arg0: i32, %arg1: i32) -> (i32, i32) {
    %c0_i32 = arith.constant 0 : i32
    %c0_i32_0 = arith.constant 0 : i32
    return %c0_i32, %arg1 : i32, i32
  }
  func.func @transform_4(%arg0: i32, %arg1: i32) -> (i32, i32) {
    %c0_i32 = arith.constant 0 : i32
    %c0_i32_0 = arith.constant 0 : i32
    %c0_i32_1 = arith.constant 0 : i32
    return %c0_i32, %c0_i32_0 : i32, i32
  }
  func.func @transform_5(%arg0: i32, %arg1: i32) -> (i32, i32) {
    %c0_i32 = arith.constant 0 : i32
    %c0_i32_0 = arith.constant 0 : i32
    return %arg0, %c0_i32 : i32, i32
  }
}

</mosaic_0001>

<bundles_post_ra>
// kernel: tpu_custom_call.1
= control target key start
LH: loop header
LB: loop body
LE: loop exit
PB: predicated region body
PF: predicated region fallthrough
CT: control target
= control target key end

     0   :  { %vm25_vm0 = vcmask 261120   ;;  %vm159_vm2 = vcmask 523264   ;;  %s557_s0 = inlined_call_operand.vmem [shape: f32[16,32], index: 0, kind: input, shape index: {}]   ;;  %s558_s1 = inlined_call_operand.vmem [shape: f32[64,32], index: 1, kind: input, shape index: {}]   ;;  %s559_s2 = inlined_call_operand.vmem [shape: f32[1,64], index: 2, kind: input, shape index: {}]   ;;  %s560_s3 = inlined_call_operand.vmem [shape: f32[32,64], index: 3, kind: input, shape index: {}]   ;;  %s561_s4 = inlined_call_operand.vmem [shape: f32[1,32], index: 4, kind: input, shape index: {}]   ;;  %s562_s5 = inlined_call_operand.hbm [shape: f32[16,32], index: 5, kind: output, shape index: {}]  }
   0x1   :  { %v30_v0 = vld [vmem:[%s558_s1] sm:$0xff]  ;;  %v31_v1 = vld [vmem:[%s558_s1 + $0x8] sm:$0xff]  ;;  %v32_v2 = vld [vmem:[%s558_s1 + $0x10] sm:$0xff] }
   0x2   :  { %v353_v3 = vpack.c.bf16 %v31_v1, %v30_v0  ;;  %vm462_vm1 = vmpackc.low %vm25_vm0, %vm25_vm0  ;;  %v33_v5 = vld [vmem:[%s558_s1 + $0x18] sm:$0xff]  ;;  %v28_v7 = vld [vmem:[%s557_s0] sm:$0xff] }
   0x3   :  { %v359_v6 = vpack.c.bf16 %v33_v5, %v32_v2  ;;  %v155_v8 = vld [vmem:[%s560_s3] sm:$0xff]  ;;  %339 = vmatprep.mubr.msk.f32.mxu0 %vm25_vm0, %v28_v7  ;;  %v156_v9 = vld [vmem:[%s560_s3 + $0x8] sm:$0xff]  ;;  %vm485_vm3 = vmpackc.low %vm159_vm2, %vm159_vm2 }
   0x4   :  { %355 = vmatprep.subr.msk.bf16.mxu0 %vm462_vm1, %v353_v3  ;;  %v157_v11 = vld [vmem:[%s560_s3 + $0x10] sm:$0xff]  ;;  %v377_v12 = vpack.c.bf16 %v156_v9, %v155_v8  ;;  %v158_v13 = vld [vmem:[%s560_s3 + $0x18] sm:$0xff] }
   0x5   :  { %358 = vmatpush3.bf16.xpose.msk.msra.mxu0 %vm462_vm1, %v353_v3 }
   0x6   :  { %361 = vmatprep.subr.msk.bf16.mxu0 %vm462_vm1, %v359_v6 }
   0x7   :  { %10 = vsyncpa [#allocation4], 0  ;;  %v34_v14 = vld [vmem:[%s558_s1 + $0x20] sm:$0xff]  ;;  %v35_v15 = vld [vmem:[%s558_s1 + $0x28] sm:$0xff]  ;;  %v383_v16 = vpack.c.bf16 %v158_v13, %v157_v11  ;;  %379 = vmatprep.subr.msk.bf16.mxu1 %vm485_vm3, %v377_v12  ;;  %v417_v22 = vmov 0.0   ;;  %s418_s21 = smov [#allocation3]  }
   0x8   :  { %382 = vmatpush3.bf16.xpose.msk.msra.mxu1 %vm485_vm3, %v377_v12  ;;  %v365_v17 = vpack.c.bf16 %v35_v15, %v34_v14  ;;  %v36_v18 = vld [vmem:[%s558_s1 + $0x30] sm:$0xff]  ;;  %v37_v19 = vld [vmem:[%s558_s1 + $0x38] sm:$0xff]  ;;  %v29_v21 = vld [vmem:[%s557_s0 + $0x8] sm:$0xff]  ;;  %27 = vst.msk [vmem:[#allocation2 + $0x8] sm:$0xff] %vm25_vm0, %v417_v22  ;;  %s278_s22 = sshll.u32 %s418_s21, 4  ;;  %s279_s22 = int_to_ptr.vmem [resolvable:$true] %s278_s22 }
   0x9   :  { %385 = vmatprep.subr.msk.bf16.mxu1 %vm485_vm3, %v383_v16  ;;  %v371_v20 = vpack.c.bf16 %v37_v19, %v36_v18  ;;  %26 = vst.msk [vmem:[#allocation2] sm:$0xff] %vm25_vm0, %v417_v22  ;;  %v289_v23 = vld [vmem:[%s559_s2] ss:$0 sm:$0xff]  ;;  %s393_s23 = scalar_lea.vmem %s279_s22, 256  ;;  %p398_p1 = scmp.lt.s32.totalorder %s279_s22, %s279_s22 }
   0xa   :  { %v306_v36 = vld [vmem:[%s561_s4] ss:$0 sm:$0xff]  ;;  %p394_p0 = scmp.ne.s32.totalorder %s279_s22, %s393_s23  ;;  %p399_p2 = scmp.lt.s32.totalorder %s393_s23, %s393_s23 }
   0xc   :  { %p400_p3 = por %p399_p2, %p398_p1 }
   0xd   :  { %364 = vmatpush3.bf16.xpose.msk.msra.mxu0 %vm462_vm1, %v359_v6 }
   0xe   :  { %367 = vmatprep.subr.msk.bf16.mxu0 %vm462_vm1, %v365_v17  ;;  %p401_p4 = pnand %p400_p3, %p394_p0 }
   0xf   :  { %v154_v30 = vld [vmem:[#allocation2 + $0x8] sm:$0xff] }
  0x10   :  { %388 = vmatpush3.bf16.xpose.msk.msra.mxu1 %vm485_vm3, %v383_v16  ;;  %v153_v31 = vld [vmem:[#allocation2] sm:$0xff] }
  0x15   :  { %370 = vmatpush3.bf16.xpose.msk.msra.mxu0 %vm462_vm1, %v365_v17 }
  0x16   :  { %373 = vmatprep.subr.msk.bf16.mxu0 %vm462_vm1, %v371_v20 }
  0x1d   :  { %376 = vmatpush3.bf16.xpose.msk.msra.mxu0 %vm462_vm1, %v371_v20 }
  0x24   :  { %340 = vmatmul.mubr.msk.f32.vlgmr.msra.gmra.mrb[0].mxu0 %vm25_vm0, %v29_v21 }
  0xf7   :  { %v341_v24 = vpop.f32.mrb[0].mxu0 }
  0xf8   :  { %v148_v25 = vadd.f32 %v341_v24, %v289_v23  ;;  %v142_v26 = vpop.f32.mrb[1].mxu0 }
  0xf9   :  { %v143_v27 = vadd.f32 %v289_v23, %v142_v26 }
  0xfa   :  { %v152_v29 = vmax.f32 %v148_v25, 0.0 }
  0xfb   :  { %v151_v28 = vmax.f32 %v143_v27, 0.0 }
  0xfd   :  { %350 = vmatprep.mubr.msk.f32.mxu1 %vm159_vm2, %v151_v28 }
  0xfe   :  { %351 = vmatmul.mubr.msk.f32.vlgmr.msra.gmra.mrb[0].mxu1 %vm159_vm2, %v152_v29 }
 0x1d1   :  { %v352_v32 = vpop.f32.mrb[0].mxu1 }
 0x1d2   :  { %v254_v33 = vadd.f32 %v352_v32, %v154_v30  ;;  %v244_v34 = vpop.f32.mrb[1].mxu1 }
 0x1d3   :  { %v253_v35 = vadd.f32 %v244_v34, %v153_v31 }
 0x1d4   :  { %256 = vst.msk [vmem:[#allocation2 + $0x8] sm:$0xff] %vm25_vm0, %v254_v33 }
 0x1d5   :  { %255 = vst.msk [vmem:[#allocation2] sm:$0xff] %vm25_vm0, %v253_v35 }
 0x1db   :  { %v261_v37 = vld [vmem:[#allocation2 + $0x8] sm:$0xff] }
 0x1dc   :  { %v260_v38 = vld [vmem:[#allocation2] sm:$0xff]  ;;  %v270_v39 = vadd.f32 %v306_v36, %v261_v37 }
 0x1dd   :  { %v269_v40 = vadd.f32 %v306_v36, %v260_v38 }
 0x1de   :  { %272 = vst.msk [vmem:[#allocation3 + $0x8] sm:$0xff] %vm25_vm0, %v270_v39 }
 0x1df   :  { %271 = vst.msk [vmem:[#allocation3] sm:$0xff] %vm25_vm0, %v269_v40 }
 0x1e0   :  { %404 = shalt.err (!%p401_p4)
}
 0x1e1   :  { %s405_s25 = scalar_lea.hbm %s562_s5, 256 }
 0x1e2   :  { %p406_p5 = scmp.ne.s32.totalorder %s562_s5, %s405_s25  ;;  %p409_p6 = scmp.lt.u32.totalorder %s405_s25, %s562_s5 }
 0x1e4   :  { %p411_p7 = pnand %p409_p6, %p406_p5 }
 0x1e6   :  { %414 = shalt.err (!%p411_p7)
}
 0x1e7   :  { %s419_s30 = smov 128   ;;  %s420_s6 = smov 8  }
 0x1e8   :  { %284 = dma.vmem_to_hbm [thread:$0]  %s279_s22, 256, %s562_s5, [#allocation4], %s419_s30, %s419_s30, %s420_s6  }
 0x1e9   :  { %415 = dma.done.wait [#allocation4], 256  }
 0x1ea   :  { %416 = vsyncadd [#allocation4], 4294967040 }
 0x1eb   :  { %288 = vsyncpa [#allocation4], 1 }

</bundles_post_ra>
